<compile_context>
chip_gen: v7x
topology: tpu7x:2x2x1
jax: 0.10.0
libtpu: 0.0.40
codegen_flags: <defaults>
</compile_context>

<pallas_src>
import jax
import jax.numpy as jnp
from jax import lax
from jax.experimental import pallas as pl
from jax.experimental.pallas import tpu as pltpu

_EPS = 1e-8  # matches torch.nn.functional.cosine_similarity default eps


def _pick_block_bytes():
    """Per-input block-size target, chosen per TPU generation."""
    try:
        vmem = int(pltpu.get_tpu_info().vmem_capacity_bytes)
    except Exception:
        vmem = 128 * 1024 * 1024
    # v7x: only 64 MiB VMEM/TC but ~2x HBM bandwidth -> slightly larger steps
    # amortize the fixed per-step overhead; 2 inputs x 2 buffers x 6 MiB fits.
    if vmem <= 96 * 1024 * 1024:
        return 6 * 1024 * 1024
    return 4 * 1024 * 1024


def _make_kernel(tb, td, sw, n_slices, rem, kf, d_total, needs_mask):
    """Builds the per-block kernel with all tiling parameters baked in."""

    def kernel(x_ref, y_ref, o_ref, dot_acc, n1_acc, n2_acc):
        k = pl.program_id(1)

        @pl.when(k == 0)
        def _init():
            dot_acc[...] = jnp.zeros_like(dot_acc)
            n1_acc[...] = jnp.zeros_like(n1_acc)
            n2_acc[...] = jnp.zeros_like(n2_acc)

        def accum(s):
            off = s * sw
            if not isinstance(off, int):
                off = pl.multiple_of(off, 128)
            xs = x_ref[:, pl.ds(off, sw)].astype(jnp.float32)
            ys = y_ref[:, pl.ds(off, sw)].astype(jnp.float32)
            if needs_mask:
                # Only emitted when the feature grid is ragged: zero the
                # out-of-bounds tail of the last feature block (mask is
                # all-true on earlier blocks, so no pl.when needed).
                col = (k * td + off
                       + lax.broadcasted_iota(jnp.int32, (1, sw), 1))
                valid = col < d_total
                xs = jnp.where(valid, xs, 0.0)
                ys = jnp.where(valid, ys, 0.0)
            # Pure elementwise (VPU) accumulation into lane/sublane-resident
            # accumulators; no cross-lane work in the steady state.
            dot_acc[...] += xs * ys
            n1_acc[...] += xs * xs
            n2_acc[...] += ys * ys

        if n_slices == 1:
            accum(0)
        elif n_slices > 1:
            def body(s, carry):
                accum(s)
                return carry
            lax.fori_loop(0, n_slices, body, 0)

        @pl.when(k == kf - 1)
        def _epilogue():
            dot = jnp.sum(dot_acc[...], axis=1, keepdims=True)
            n1 = jnp.sum(n1_acc[...], axis=1, keepdims=True)
            n2 = jnp.sum(n2_acc[...], axis=1, keepdims=True)
            if rem > 0:
                # Exact ragged tail of a full-feature-dim block (kf == 1
                # whenever rem > 0): lane-aligned start, arbitrary width.
                off = n_slices * sw
                xs = x_ref[:, off:off + rem].astype(jnp.float32)
                ys = y_ref[:, off:off + rem].astype(jnp.float32)
                dot = dot + jnp.sum(xs * ys, axis=1, keepdims=True)
                n1 = n1 + jnp.sum(xs * xs, axis=1, keepdims=True)
                n2 = n2 + jnp.sum(ys * ys, axis=1, keepdims=True)
            denom = jnp.maximum(jnp.sqrt(n1 * n2), _EPS)
            loss = -(dot / denom)                              # (tb, 1)
            o_ref[...] = jnp.broadcast_to(loss, (tb, 128)).astype(o_ref.dtype)

    return kernel


def similarity_loss(x, y, *, flatten: bool = False, reduction: str = "mean",
                    block_bytes=None):
    """Pallas TPU implementation of SimilarityLoss.forward."""
    assert x.shape == y.shape, "input/target shape mismatch"
    if flatten:
        x2 = x.reshape(x.shape[0], -1)
        y2 = y.reshape(y.shape[0], -1)
    else:
        # TODO(synk): flatten=False with >2-D inputs (per-spatial-location
        # cosine over dim=1) is not implemented in the kernel.
        assert x.ndim == 2, "non-flatten path implemented for 2-D inputs only"
        x2, y2 = x, y
    if y2.dtype != x2.dtype:
        y2 = y2.astype(x2.dtype)

    B, D = x2.shape
    itemsize = jnp.dtype(x2.dtype).itemsize
    sub_mult = max(8, 32 // itemsize)       # sublane packing: 8 f32 / 16 bf16
    if block_bytes is None:
        block_bytes = _pick_block_bytes()
    block_bytes = max(int(block_bytes), 256 * 1024)

    # ---- row-block size: batch rows so each grid step moves ~block_bytes ---
    row_cap = 512                            # bounds accumulators / VMEM temps
    rows_fit = max(1, block_bytes // max(1, D * itemsize))
    if rows_fit >= B:
        tb = min(B, row_cap)
    else:
        tb = min(B, max(sub_mult, (rows_fit // sub_mult) * sub_mult))
    # tb is either == B (full dim) or a multiple of the sublane packing.

    # ---- in-kernel slice width (bounds f32 temporaries to ~0.5 MiB each) ---
    mult = max(1, min(64, (128 * 1024) // (tb * 128)))
    sw = 128 * mult

    # ---- feature-block size -------------------------------------------------
    elems_fit = max(128, block_bytes // (tb * itemsize))
    if D <= elems_fit:
        td = D                               # exact full row: no pad, no mask
        sw = min(sw, max(128, (td // 128) * 128))
        needs_mask = False
    else:
        td = max(sw, (elems_fit // sw) * sw)  # multiple of sw (and of 128)
        needs_mask = (D % td) != 0            # ragged tail masked in-kernel
    n_slices = td // sw
    rem = td % sw
    kf = pl.cdiv(D, td)
    nb = pl.cdiv(B, tb)
    assert rem == 0 or kf == 1               # ragged tail only on 1-block rows

    # ---- VMEM budget computed from the actual footprint ---------------------
    in_blk = tb * td * itemsize
    acc_bytes = 3 * tb * sw * 4
    out_blk = tb * 128 * 4
    tmp_bytes = 8 * tb * sw * 4              # headroom for unfused temporaries
    need = 2 * 2 * in_blk + 2 * out_blk + acc_bytes + tmp_bytes
    vmem_limit = int(min(48 * 1024 * 1024,
                         max(32 * 1024 * 1024, (need * 13) // 10)))

    kernel = _make_kernel(tb, td, sw, n_slices, rem, kf, D, needs_mask)

    out = pl.pallas_call(
        kernel,
        out_shape=jax.ShapeDtypeStruct((B, 128), jnp.float32),
        grid_spec=pltpu.PrefetchScalarGridSpec(
            num_scalar_prefetch=0,
            grid=(nb, kf),
            in_specs=[
                pl.BlockSpec((tb, td), lambda b, k: (b, k)),
                pl.BlockSpec((tb, td), lambda b, k: (b, k)),
            ],
            out_specs=pl.BlockSpec((tb, 128), lambda b, k: (b, 0)),
            scratch_shapes=[pltpu.VMEM((tb, sw), jnp.float32)] * 3,
        ),
        compiler_params=pltpu.CompilerParams(
            dimension_semantics=("parallel", "arbitrary"),
            vmem_limit_bytes=vmem_limit,
        ),
    )(x2, y2)

    # TODO(synk): for B == 1 on v7x the 'parallel' batch axis leaves one
    # TensorCore idle; splitting the feature axis across cores (per-core
    # partials combined here) would recover up to ~2x on that corner.
    per_row = out[:, 0]                      # (B,) negative cosine similarities
    if reduction == "mean":
        return jnp.mean(per_row)
    if reduction == "sum":
        return jnp.sum(per_row)
    return per_row


def _reference(x, y, flatten=True, reduction="mean"):
    if flatten:
        x = x.reshape(x.shape[0], -1)
        y = y.reshape(y.shape[0], -1)
    x = x.astype(jnp.float32)
    y = y.astype(jnp.float32)
    dot = jnp.sum(x * y, axis=1)
    denom = jnp.maximum(jnp.sqrt(jnp.sum(x * x, axis=1))
                        * jnp.sqrt(jnp.sum(y * y, axis=1)), _EPS)
    loss = -(dot / denom)
    if reduction == "mean":
        return loss.mean()
    if reduction == "sum":
        return loss.sum()
    return loss


if __name__ == "__main__":
    key = jax.random.PRNGKey(0)
    k1, k2, k3, k4, k5, k6 = jax.random.split(key, 6)

    # SimilarityLoss has no parameters; inputs mimic NCHW feature maps.
    x = jax.random.normal(k1, (2, 4, 16, 16), dtype=jnp.float32)
    y = jax.random.normal(k2, (2, 4, 16, 16), dtype=jnp.float32)

    out = jax.block_until_ready(
        similarity_loss(x, y, flatten=True, reduction="mean"))
    ref = _reference(x, y, flatten=True, reduction="mean")
    assert jnp.allclose(out, ref, atol=1e-5, rtol=1e-5), (out, ref)

    # 'sum' reduction path
    out_sum = jax.block_until_ready(
        similarity_loss(x, y, flatten=True, reduction="sum"))
    ref_sum = _reference(x, y, flatten=True, reduction="sum")
    assert jnp.allclose(out_sum, ref_sum, atol=1e-5, rtol=1e-5), (out_sum, ref_sum)

    # Ragged feature dim (D = 315): exact full-dim block, in-kernel tail sums.
    xr = jax.random.normal(k3, (3, 5, 7, 9), dtype=jnp.float32)
    yr = jax.random.normal(k4, (3, 5, 7, 9), dtype=jnp.float32)
    out_r = jax.block_until_ready(
        similarity_loss(xr, yr, flatten=True, reduction="mean"))
    ref_r = _reference(xr, yr, flatten=True, reduction="mean")
    assert jnp.allclose(out_r, ref_r, atol=1e-5, rtol=1e-5), (out_r, ref_r)

    # bf16 inputs streamed at half the HBM bytes, f32 accumulation in-kernel.
    xb = x.astype(jnp.bfloat16)
    yb = y.astype(jnp.bfloat16)
    out_b = jax.block_until_ready(
        similarity_loss(xb, yb, flatten=True, reduction="mean"))
    ref_b = _reference(xb, yb, flatten=True, reduction="mean")
    assert jnp.allclose(out_b, ref_b, atol=1e-4, rtol=1e-4), (out_b, ref_b)

    # Forced multi-block feature axis with a ragged tail: exercises the
    # fori_loop accumulation, multi-step k accumulators and the in-kernel
    # iota mask (small block_bytes keeps this test tiny and fast).
    xg = jax.random.normal(k5, (2, 100003), dtype=jnp.float32)
    yg = jax.random.normal(k6, (2, 100003), dtype=jnp.float32)
    out_g = jax.block_until_ready(
        similarity_loss(xg, yg, flatten=True, reduction="none",
                        block_bytes=256 * 1024))
    ref_g = _reference(xg, yg, flatten=True, reduction="none")
    assert jnp.allclose(out_g, ref_g, atol=1e-4, rtol=1e-4), (out_g, ref_g)

    print("KERNEL_OK")
</pallas_src>

<mosaic_0001>
module attributes {stable_mosaic.version = 11 : i64} {
  func.func @kernel(%arg0: i32, %arg1: i32, %arg2: memref<2x1024xf32, #tpu.memory_space<vmem>>, %arg3: memref<2x1024xf32, #tpu.memory_space<vmem>>, %arg4: memref<2x128xf32, #tpu.memory_space<vmem>>, %arg5: memref<2x1024xf32, #tpu.memory_space<vmem>>, %arg6: memref<2x1024xf32, #tpu.memory_space<vmem>>, %arg7: memref<2x1024xf32, #tpu.memory_space<vmem>>) attributes {dimension_semantics = [#tpu.dimension_semantics<parallel>, #tpu.dimension_semantics<arbitrary>], iteration_bounds = array<i64: 1, 1>, scalar_prefetch = 0 : i64, scratch_operands = 3 : i64, tpu.core_type = #tpu.core_type<tc>, window_params = [{transform_indices = @transform_0, window_bounds = array<i64: 2, 1024>}, {transform_indices = @transform_1, window_bounds = array<i64: 2, 1024>}, {transform_indices = @transform_2, window_bounds = array<i64: 2, 128>}]} {
    %c0_i32 = arith.constant 0 : i32
    %0 = arith.cmpi eq, %arg1, %c0_i32 : i32
    %1 = arith.extui %0 : i1 to i32
    %c0_i32_0 = arith.constant 0 : i32
    %2 = arith.cmpi ne, %1, %c0_i32_0 : i32
    scf.if %2 {
      %cst = arith.constant 0.000000e+00 : f32
      %20 = vector.broadcast %cst : f32 to vector<2x1024xf32>
      %c0_18 = arith.constant 0 : index
      %c0_19 = arith.constant 0 : index
      %21 = vector.load %arg5[%c0_18, %c0_19] : memref<2x1024xf32, #tpu.memory_space<vmem>>, vector<2x1024xf32>
      tpu.vector_store %arg5[%c0_18, %c0_19], %20 {strides = array<i32>} : memref<2x1024xf32, #tpu.memory_space<vmem>>, vector<2x1024xf32>,
      %cst_20 = arith.constant 0.000000e+00 : f32
      %22 = vector.broadcast %cst_20 : f32 to vector<2x1024xf32>
      %c0_21 = arith.constant 0 : index
      %c0_22 = arith.constant 0 : index
      %23 = vector.load %arg6[%c0_21, %c0_22] : memref<2x1024xf32, #tpu.memory_space<vmem>>, vector<2x1024xf32>
      tpu.vector_store %arg6[%c0_21, %c0_22], %22 {strides = array<i32>} : memref<2x1024xf32, #tpu.memory_space<vmem>>, vector<2x1024xf32>,
      %cst_23 = arith.constant 0.000000e+00 : f32
      %24 = vector.broadcast %cst_23 : f32 to vector<2x1024xf32>
      %c0_24 = arith.constant 0 : index
      %c0_25 = arith.constant 0 : index
      %25 = vector.load %arg7[%c0_24, %c0_25] : memref<2x1024xf32, #tpu.memory_space<vmem>>, vector<2x1024xf32>
      tpu.vector_store %arg7[%c0_24, %c0_25], %24 {strides = array<i32>} : memref<2x1024xf32, #tpu.memory_space<vmem>>, vector<2x1024xf32>,
    } else {
    }
    %c0 = arith.constant 0 : index
    %c0_1 = arith.constant 0 : index
    %3 = vector.load %arg2[%c0, %c0_1] : memref<2x1024xf32, #tpu.memory_space<vmem>>, vector<2x1024xf32>
    %c0_2 = arith.constant 0 : index
    %c0_3 = arith.constant 0 : index
    %4 = vector.load %arg3[%c0_2, %c0_3] : memref<2x1024xf32, #tpu.memory_space<vmem>>, vector<2x1024xf32>
    %c0_4 = arith.constant 0 : index
    %c0_5 = arith.constant 0 : index
    %5 = vector.load %arg5[%c0_4, %c0_5] : memref<2x1024xf32, #tpu.memory_space<vmem>>, vector<2x1024xf32>
    %6 = arith.mulf %3, %4 : vector<2x1024xf32>
    %7 = arith.addf %5, %6 : vector<2x1024xf32>
    %c0_6 = arith.constant 0 : index
    %c0_7 = arith.constant 0 : index
    %8 = vector.load %arg5[%c0_6, %c0_7] : memref<2x1024xf32, #tpu.memory_space<vmem>>, vector<2x1024xf32>
    tpu.vector_store %arg5[%c0_6, %c0_7], %7 {strides = array<i32>} : memref<2x1024xf32, #tpu.memory_space<vmem>>, vector<2x1024xf32>,
    %c0_8 = arith.constant 0 : index
    %c0_9 = arith.constant 0 : index
    %9 = vector.load %arg6[%c0_8, %c0_9] : memref<2x1024xf32, #tpu.memory_space<vmem>>, vector<2x1024xf32>
    %10 = arith.mulf %3, %3 : vector<2x1024xf32>
    %11 = arith.addf %9, %10 : vector<2x1024xf32>
    %c0_10 = arith.constant 0 : index
    %c0_11 = arith.constant 0 : index
    %12 = vector.load %arg6[%c0_10, %c0_11] : memref<2x1024xf32, #tpu.memory_space<vmem>>, vector<2x1024xf32>
    tpu.vector_store %arg6[%c0_10, %c0_11], %11 {strides = array<i32>} : memref<2x1024xf32, #tpu.memory_space<vmem>>, vector<2x1024xf32>,
    %c0_12 = arith.constant 0 : index
    %c0_13 = arith.constant 0 : index
    %13 = vector.load %arg7[%c0_12, %c0_13] : memref<2x1024xf32, #tpu.memory_space<vmem>>, vector<2x1024xf32>
    %14 = arith.mulf %4, %4 : vector<2x1024xf32>
    %15 = arith.addf %13, %14 : vector<2x1024xf32>
    %c0_14 = arith.constant 0 : index
    %c0_15 = arith.constant 0 : index
    %16 = vector.load %arg7[%c0_14, %c0_15] : memref<2x1024xf32, #tpu.memory_space<vmem>>, vector<2x1024xf32>
    tpu.vector_store %arg7[%c0_14, %c0_15], %15 {strides = array<i32>} : memref<2x1024xf32, #tpu.memory_space<vmem>>, vector<2x1024xf32>,
    %c0_i32_16 = arith.constant 0 : i32
    %17 = arith.cmpi eq, %arg1, %c0_i32_16 : i32
    %18 = arith.extui %17 : i1 to i32
    %c0_i32_17 = arith.constant 0 : i32
    %19 = arith.cmpi ne, %18, %c0_i32_17 : i32
    scf.if %19 {
      %c0_18 = arith.constant 0 : index
      %c0_19 = arith.constant 0 : index
      %20 = vector.load %arg5[%c0_18, %c0_19] : memref<2x1024xf32, #tpu.memory_space<vmem>>, vector<2x1024xf32>
      %cst = arith.constant dense<0.000000e+00> : vector<2xf32>
      %21 = vector.multi_reduction <add>, %20, %cst [1] : vector<2x1024xf32> to vector<2xf32>
      %22 = vector.shape_cast %21 : vector<2xf32> to vector<2x1xf32>
      %c0_20 = arith.constant 0 : index
      %c0_21 = arith.constant 0 : index
      %23 = vector.load %arg6[%c0_20, %c0_21] : memref<2x1024xf32, #tpu.memory_space<vmem>>, vector<2x1024xf32>
      %cst_22 = arith.constant dense<0.000000e+00> : vector<2xf32>
      %24 = vector.multi_reduction <add>, %23, %cst_22 [1] : vector<2x1024xf32> to vector<2xf32>
      %25 = vector.shape_cast %24 : vector<2xf32> to vector<2x1xf32>
      %c0_23 = arith.constant 0 : index
      %c0_24 = arith.constant 0 : index
      %26 = vector.load %arg7[%c0_23, %c0_24] : memref<2x1024xf32, #tpu.memory_space<vmem>>, vector<2x1024xf32>
      %cst_25 = arith.constant dense<0.000000e+00> : vector<2xf32>
      %27 = vector.multi_reduction <add>, %26, %cst_25 [1] : vector<2x1024xf32> to vector<2xf32>
      %28 = vector.shape_cast %27 : vector<2xf32> to vector<2x1xf32>
      %29 = arith.mulf %25, %28 : vector<2x1xf32>
      %30 = math.sqrt %29 : vector<2x1xf32>
      %cst_26 = arith.constant 9.99999993E-9 : f32
      %31 = vector.broadcast %cst_26 : f32 to vector<2x1xf32>
      %32 = arith.maximumf %30, %31 : vector<2x1xf32>
      %33 = arith.divf %22, %32 : vector<2x1xf32>
      %cst_27 = arith.constant 0.000000e+00 : f32
      %34 = vector.broadcast %cst_27 : f32 to vector<2x1xf32>
      %35 = arith.subf %34, %33 : vector<2x1xf32>
      %36 = vector.shape_cast %35 : vector<2x1xf32> to vector<2x1xf32>
      %37 = vector.broadcast %36 : vector<2x1xf32> to vector<2x128xf32>
      %c0_28 = arith.constant 0 : index
      %c0_29 = arith.constant 0 : index
      %38 = vector.load %arg4[%c0_28, %c0_29] : memref<2x128xf32, #tpu.memory_space<vmem>>, vector<2x128xf32>
      tpu.vector_store %arg4[%c0_28, %c0_29], %37 {strides = array<i32>} : memref<2x128xf32, #tpu.memory_space<vmem>>, vector<2x128xf32>,
    } else {
    }
    return
  }
  func.func @transform_0(%arg0: i32, %arg1: i32) -> (i32, i32) {
    %c0_i32 = arith.constant 0 : i32
    return %arg0, %arg1 : i32, i32
  }
  func.func @transform_1(%arg0: i32, %arg1: i32) -> (i32, i32) {
    %c0_i32 = arith.constant 0 : i32
    return %arg0, %arg1 : i32, i32
  }
  func.func @transform_2(%arg0: i32, %arg1: i32) -> (i32, i32) {
    %c0_i32 = arith.constant 0 : i32
    %c0_i32_0 = arith.constant 0 : i32
    return %arg0, %c0_i32 : i32, i32
  }
}

</mosaic_0001>

<bundles_post_ra>
// kernel: tpu_custom_call.1
= control target key start
LH: loop header
LB: loop body
LE: loop exit
PB: predicated region body
PF: predicated region fallthrough
CT: control target
= control target key end

     0   :  { %7 = vsyncpa [#allocation6], 0  ;;  %s469_s0 = inlined_call_operand.hbm [shape: f32[2,1024], index: 0, kind: input, shape index: {}]   ;;  %s470_s1 = inlined_call_operand.hbm [shape: f32[2,1024], index: 1, kind: input, shape index: {}]   ;;  %s471_s2 = inlined_call_operand.hbm [shape: f32[2,128], index: 2, kind: output, shape index: {}]  }
   0x1   :  { %8 = vsyncpa [#allocation9], 0 }
   0x2   :  { %9 = vsyncpa [#allocation7], 0  ;;  %s376_s9 = smov [#allocation5]   ;;  %s377_s11 = smov [#allocation8]  }
   0x3   :  { %s16_s10 = sshll.u32 %s376_s9, 4  ;;  %s26_s12 = sshll.u32 %s377_s11, 4  ;;  %s17_s10 = int_to_ptr.vmem [resolvable:$true] %s16_s10  ;;  %s27_s12 = int_to_ptr.vmem [resolvable:$true] %s26_s12 }
   0x4   :  { %s304_s15 = scalar_lea.hbm %s469_s0, 256 }
   0x5   :  { %p305_p0 = scmp.ne.s32.totalorder %s469_s0, %s304_s15  ;;  %p308_p1 = scmp.lt.u32.totalorder %s304_s15, %s469_s0 }
   0x7   :  { %p310_p2 = pnand %p308_p1, %p305_p0 }
   0x9   :  { %313 = shalt.err (!%p310_p2)
}
   0xa   :  { %s314_s20 = scalar_lea.vmem %s17_s10, 256  ;;  %p319_p4 = scmp.lt.s32.totalorder %s17_s10, %s17_s10 }
   0xb   :  { %p315_p3 = scmp.ne.s32.totalorder %s17_s10, %s314_s20  ;;  %p320_p5 = scmp.lt.s32.totalorder %s314_s20, %s314_s20 }
   0xd   :  { %p321_p6 = por %p320_p5, %p319_p4 }
   0xf   :  { %p322_p7 = pnand %p321_p6, %p315_p3 }
  0x11   :  { %325 = shalt.err (!%p322_p7)
}
  0x12   :  { %19 = dma.hbm_to_vmem [thread:$0]  %s469_s0, 256, %s17_s10, [#allocation6]  }
  0x13   :  { %s326_s25 = scalar_lea.hbm %s470_s1, 256 }
  0x14   :  { %p327_p8 = scmp.ne.s32.totalorder %s470_s1, %s326_s25  ;;  %p330_p9 = scmp.lt.u32.totalorder %s326_s25, %s470_s1 }
  0x16   :  { %p332_p10 = pnand %p330_p9, %p327_p8 }
  0x18   :  { %335 = shalt.err (!%p332_p10)
}
  0x19   :  { %s336_s30 = scalar_lea.vmem %s27_s12, 256  ;;  %p341_p12 = scmp.lt.s32.totalorder %s27_s12, %s27_s12 }
  0x1a   :  { %p337_p11 = scmp.ne.s32.totalorder %s27_s12, %s336_s30  ;;  %p342_p13 = scmp.lt.s32.totalorder %s336_s30, %s336_s30 }
  0x1c   :  { %p343_p0 = por %p342_p13, %p341_p12 }
  0x1e   :  { %p344_p1 = pnand %p343_p0, %p337_p11 }
  0x20   :  { %347 = shalt.err (!%p344_p1)
}
  0x21   :  { %29 = dma.hbm_to_vmem [thread:$0]  %s470_s1, 256, %s27_s12, [#allocation9]  }
  0x22   :  { %370 = dma.done.wait [#allocation6], 256  }
  0x23   :  { %371 = vsyncadd [#allocation6], 4294967040 }
  0x24   :  { %372 = dma.done.wait [#allocation9], 256  }
  0x25   :  { %373 = vsyncadd [#allocation9], 4294967040  ;;  %v85_v0 = vlaneseq  ;;  %v378_v1 = vmov 1983009808   ;;  %v46_v6 = vld [vmem:[#allocation5] sm:$0xff]  ;;  %v47_v7 = vld [vmem:[#allocation5 + $0x8] sm:$0xff] }
  0x26   :  { %v83_v2 = vunpack.c.l.s4 %v378_v1  ;;  %v48_v8 = vld [vmem:[#allocation8] sm:$0xff]  ;;  %v60_v9 = vmul.f32 %v46_v6, %v46_v6  ;;  %v61_v10 = vmul.f32 %v47_v7, %v47_v7  ;;  %v49_v11 = vld [vmem:[#allocation8 + $0x8] sm:$0xff]  ;;  %vm123_vm0 = vcmask 1041408   ;;  %s379_s1 = smov [#allocation10]  }
  0x27   :  { %v86_v3 = vshrl.u32 %v85_v0, 7  ;;  %v68_v12 = vmul.f32 %v48_v8, %v48_v8  ;;  %v69_v16 = vmul.f32 %v49_v11, %v49_v11  ;;  %v52_v35 = vmul.f32 %v48_v8, %v46_v6  ;;  %s286_s4 = sshll.u32 %s379_s1, 4  ;;  %s287_s4 = int_to_ptr.vmem [resolvable:$true] %s286_s4 }
  0x28   :  { %v84_v4 = vunpack.c.0.s8 %v83_v2  ;;  %v145_v13 = vcombine.high %v60_v9, %v60_v9  ;;  %v162_v15 = vcombine.high %v61_v10, %v61_v10  ;;  %v53_v36 = vmul.f32 %v49_v11, %v47_v7  ;;  %s348_s5 = scalar_lea.vmem %s287_s4, 32  ;;  %p353_p3 = scmp.lt.s32.totalorder %s287_s4, %s287_s4 }
  0x29   :  { %v208_v17 = vcombine.high %v68_v12, %v68_v12  ;;  %v225_v25 = vcombine.high %v69_v16, %v69_v16  ;;  %v81_v48 = vcombine.high %v52_v35, %v52_v35  ;;  %p349_p2 = scmp.ne.s32.totalorder %s287_s4, %s348_s5  ;;  %p354_p4 = scmp.lt.s32.totalorder %s348_s5, %s348_s5 }
  0x2a   :  { %v419_v5 = vsub.s32 %v84_v4, %v86_v3  ;;  %v98_v56 = vcombine.high %v53_v36, %v53_v36 }
  0x2b   :  { %p355_p5 = por %p354_p4, %p353_p3 }
  0x2c   :  { %v152_v14 = vrot.slane %v60_v9, %v419_v5  ;;  %v215_v18 = vrot.slane %v68_v12, %v419_v5  ;;  %v159_v19 = vrot.slane %v145_v13, %v419_v5  ;;  %v169_v21 = vrot.slane %v61_v10, %v419_v5 }
  0x2d   :  { %v222_v23 = vrot.slane %v208_v17, %v419_v5  ;;  %v176_v27 = vrot.slane %v162_v15, %v419_v5  ;;  %v232_v32 = vrot.slane %v69_v16, %v419_v5  ;;  %v239_v43 = vrot.slane %v225_v25, %v419_v5  ;;  %p356_p6 = pnand %p355_p5, %p349_p2 }
  0x2e   :  { %v160_v20 = vcombine.high %v152_v14, %v152_v14  ;;  %v187_v22 = vsel %vm123_vm0, %v152_v14, 0.0  ;;  %v223_v24 = vcombine.high %v215_v18, %v215_v18  ;;  %v161_v26 = vcombine.high %v159_v19, %v159_v19 }
  0x2f   :  { %v190_v29 = vsel %vm123_vm0, %v159_v19, 0.0  ;;  %v224_v31 = vcombine.high %v222_v23, %v222_v23  ;;  %v177_v33 = vcombine.high %v169_v21, %v169_v21  ;;  %v250_v38 = vsel %vm123_vm0, %v215_v18, 0.0 }
  0x30   :  { %v188_v28 = vsel %vm123_vm0, %v160_v20, 0.0  ;;  %v192_v34 = vsel %vm123_vm0, %v161_v26, 0.0  ;;  %v251_v39 = vsel %vm123_vm0, %v223_v24, 0.0  ;;  %v253_v40 = vsel %vm123_vm0, %v222_v23, 0.0 }
  0x31   :  { %v189_v30 = vadd.f32 %v188_v28, %v187_v22  ;;  %v178_v41 = vcombine.high %v176_v27, %v176_v27  ;;  %v194_v42 = vsel %vm123_vm0, %v169_v21, 0.0  ;;  %v252_v44 = vadd.f32 %v251_v39, %v250_v38 }
  0x32   :  { %v240_v46 = vcombine.high %v232_v32, %v232_v32  ;;  %v255_v47 = vsel %vm123_vm0, %v224_v31, 0.0  ;;  %v196_v49 = vsel %vm123_vm0, %v177_v33, 0.0  ;;  %v198_v50 = vsel %vm123_vm0, %v176_v27, 0.0 }
  0x33   :  { %v191_v37 = vadd.f32 %v190_v29, %v189_v30  ;;  %v254_v51 = vadd.f32 %v253_v40, %v252_v44  ;;  %v88_v52 = vrot.slane %v52_v35, %v419_v5  ;;  %v257_v54 = vsel %vm123_vm0, %v232_v32, 0.0 }
  0x34   :  { %v95_v55 = vrot.slane %v81_v48, %v419_v5  ;;  %v105_v59 = vrot.slane %v53_v36, %v419_v5  ;;  %v241_v62 = vcombine.high %v239_v43, %v239_v43  ;;  %v259_v63 = vsel %vm123_vm0, %v240_v46, 0.0 }
  0x35   :  { %v193_v45 = vadd.f32 %v192_v34, %v191_v37  ;;  %v256_v57 = vadd.f32 %v255_v47, %v254_v51  ;;  %v96_v58 = vcombine.high %v88_v52, %v88_v52  ;;  %v124_v60 = vsel %vm123_vm0, %v88_v52, 0.0 }
  0x36   :  { %v97_v0 = vcombine.high %v95_v55, %v95_v55  ;;  %v200_v1 = vsel %vm123_vm0, %v178_v41, 0.0  ;;  %v127_v4 = vsel %vm123_vm0, %v95_v55, 0.0  ;;  %v261_v7 = vsel %vm123_vm0, %v239_v43, 0.0 }
  0x37   :  { %v195_v53 = vadd.f32 %v194_v42, %v193_v45  ;;  %v258_v2 = vadd.f32 %v257_v54, %v256_v57  ;;  %v125_v3 = vsel %vm123_vm0, %v96_v58, 0.0  ;;  %v112_v10 = vrot.slane %v98_v56, %v419_v5 }
  0x38   :  { %v126_v8 = vadd.f32 %v125_v3, %v124_v60  ;;  %v113_v11 = vcombine.high %v105_v59, %v105_v59  ;;  %v129_v12 = vsel %vm123_vm0, %v97_v0, 0.0  ;;  %v263_v14 = vsel %vm123_vm0, %v241_v62, 0.0 }
  0x39   :  { %v197_v61 = vadd.f32 %v196_v49, %v195_v53  ;;  %v260_v9 = vadd.f32 %v259_v63, %v258_v2  ;;  %v131_v17 = vsel %vm123_vm0, %v105_v59, 0.0  ;;  %v114_v20 = vcombine.high %v112_v10, %v112_v10 }
  0x3a   :  { %v128_v15 = vadd.f32 %v127_v4, %v126_v8  ;;  %v133_v21 = vsel %vm123_vm0, %v113_v11, 0.0  ;;  %v135_v23 = vsel %vm123_vm0, %v112_v10, 0.0 }
  0x3b   :  { %v199_v6 = vadd.f32 %v198_v50, %v197_v61  ;;  %v262_v16 = vadd.f32 %v261_v7, %v260_v9  ;;  %v137_v24 = vsel %vm123_vm0, %v114_v20, 0.0 }
  0x3c   :  { %v130_v18 = vadd.f32 %v129_v12, %v128_v15 }
  0x3d   :  { %v201_v13 = vadd.f32 %v200_v1, %v199_v6  ;;  %v264_v19 = vadd.f32 %v263_v14, %v262_v16 }
  0x3e   :  { %v132_v22 = vadd.f32 %v131_v17, %v130_v18 }
  0x3f   :  { %202 = vadd.xlane.f32.xlu0 %v201_v13 }
  0x40   :  { %v134_v5 = vadd.f32 %v133_v21, %v132_v22 }
  0x42   :  { %v136_v25 = vadd.f32 %v135_v23, %v134_v5 }
  0x43   :  { %265 = vadd.xlane.f32.xlu0 %v264_v19 }
  0x44   :  { %v138_v26 = vadd.f32 %v137_v24, %v136_v25 }
  0x46   :  { %139 = vadd.xlane.f32.xlu1 %v138_v26 }
  0xcc   :  { %v203_v27 = vpop.xlane.xlu0 %202 }
  0xd0   :  { %v266_v28 = vpop.xlane.xlu0 %265 }
  0xd1   :  { %v267_v29 = vmul.f32 %v266_v28, %v203_v27 }
  0xd3   :  { %300 = vrsqrt.f32 %v267_v29  ;;  %vm270_vm1 = vcmp.eq.f32.partialorder %v267_v29, inf  ;;  %v273_v32 = vand.u32 2147483648, %v267_v29  ;;  %vm272_vm2 = vcmp.eq.f32.partialorder %v267_v29, 0.0  ;;  %v140_v36 = vpop.xlane.xlu1 %139 }
  0xdd   :  { %v301_v30 = vpop.eup %300 }
  0xde   :  { %v269_v31 = vmul.f32 %v301_v30, %v267_v29 }
  0xe0   :  { %v271_v33 = vsel %vm270_vm1, %v267_v29, %v269_v31 }
  0xe1   :  { %v274_v34 = vsel %vm272_vm2, %v273_v32, %v271_v33 }
  0xe2   :  { %v275_v35 = vmax.f32 %v274_v34, 1e-08 }
  0xe4   :  { %302 = vrcp.f32 %v275_v35 }
  0xee   :  { %v303_v37 = vpop.eup %302 }
  0xef   :  { %v277_v38 = vmul.f32 %v303_v37, %v140_v36 }
  0xf1   :  { %v278_v39 = vsub.f32 0.0, %v277_v38 }
  0xf3   :  { %279 = vst [vmem:[#allocation10] sm:$0x3] %v278_v39 }
  0xf4   :  { %359 = shalt.err (!%p356_p6)
}
  0xf5   :  { %s360_s8 = scalar_lea.hbm %s471_s2, 32 }
  0xf6   :  { %p361_p7 = scmp.ne.s32.totalorder %s471_s2, %s360_s8  ;;  %p364_p8 = scmp.lt.u32.totalorder %s360_s8, %s471_s2 }
  0xf8   :  { %p366_p9 = pnand %p364_p8, %p361_p7 }
  0xfa   :  { %369 = shalt.err (!%p366_p9)
}
  0xfb   :  { %289 = dma.vmem_to_hbm [thread:$0]  %s287_s4, 32, %s471_s2, [#allocation7]  }
  0xfc   :  { %374 = dma.done.wait [#allocation7], 32  }
  0xfd   :  { %375 = vsyncadd [#allocation7], 4294967264 }
  0xfe   :  { %293 = vsyncpa [#allocation6], 1 }
  0xff   :  { %294 = vsyncpa [#allocation9], 1 }
 0x100   :  { %295 = vsyncpa [#allocation7], 1 }

</bundles_post_ra>
